<compile_context>
chip_gen: v7x
topology: tpu7x:2x2x1
jax: 0.10.0
libtpu: 0.0.40
codegen_flags: <defaults>
</compile_context>

<pallas_src>
import jax
import jax.numpy as jnp
from jax.experimental import pallas as pl
from jax.experimental.pallas import tpu as pltpu


def _round_up(x: int, m: int) -> int:
    return (x + m - 1) // m * m


def _swiglu_kernel(x_ref, wv_ref, b_ref, o_ref):
    tn = o_ref.shape[-1]
    # Single fused MXU matmul: (tm, K) @ (K, 2*tn) -> (tm, 2*tn), f32 accumulate.
    acc = jnp.dot(x_ref[...], wv_ref[...], preferred_element_type=jnp.float32)
    acc = acc + b_ref[...]          # packed bias (1, 2*tn), f32
    gate = acc[:, :tn]              # x @ W_j + b_w   (lane-tile-aligned slice)
    val = acc[:, tn:]               # x @ V_j + b_v
    o_ref[...] = (gate * jax.nn.sigmoid(gate) * val).astype(o_ref.dtype)


def _pack_fused(w, b_w, v, b_v, n_p, tn):
    """Pack [W|V] and [b_w|b_v] per N-tile so a (dim, 2*tn) weight block holds
    the matching gate/value columns contiguously along the lane axis."""
    dim_in, dim_out = w.shape
    pad = n_p - dim_out
    w_p = jnp.pad(w, ((0, 0), (0, pad)))
    v_p = jnp.pad(v, ((0, 0), (0, pad)))
    bw_p = jnp.pad(b_w, (0, pad)).astype(jnp.float32)
    bv_p = jnp.pad(b_v, (0, pad)).astype(jnp.float32)
    n_tiles = n_p // tn
    wv = jnp.concatenate(
        [w_p.reshape(dim_in, n_tiles, tn), v_p.reshape(dim_in, n_tiles, tn)],
        axis=-1).reshape(dim_in, 2 * n_p)
    b = jnp.concatenate(
        [bw_p.reshape(n_tiles, tn), bv_p.reshape(n_tiles, tn)],
        axis=-1).reshape(1, 2 * n_p)
    return wv, b


def swiglu_pallas(x, w, b_w, v, b_v, *, tm=512, tn=256, compute_dtype=None):
    """x: (..., dim). w, v: (dim, dim) stored as (in, out) — i.e. x @ w matches
    PyTorch's x @ W^T. b_*: (dim,). compute_dtype: optional MXU operand dtype
    (e.g. jnp.bfloat16); accumulation and the activation stay in f32."""
    orig_shape = x.shape
    dim = orig_shape[-1]
    out_dtype = x.dtype

    x2d = x.reshape(-1, dim)
    M = x2d.shape[0]

    # --- tile selection ---------------------------------------------------
    n_p = _round_up(dim, 128)                  # lane-dense output width
    tn_eff = tn if (n_p % tn == 0) else 128    # 128 always divides n_p
    tn_eff = min(tn_eff, n_p)

    tm_eff = min(tm, _round_up(M, 8))
    tm_eff = max(8, tm_eff - tm_eff % 8)       # keep sublane-aligned
    m_p = _round_up(M, tm_eff)

    # --- operand packing / padding -----------------------------------------
    wv, b = _pack_fused(w, b_w, v, b_v, n_p, tn_eff)
    if m_p > M:
        x2d = jnp.pad(x2d, ((0, m_p - M), (0, 0)))
    if compute_dtype is not None:
        x2d = x2d.astype(compute_dtype)
        wv = wv.astype(compute_dtype)

    grid = (n_p // tn_eff, m_p // tm_eff)      # (N tiles outer, token tiles inner)

    cost = pl.CostEstimate(
        flops=2 * m_p * dim * (2 * n_p) + 4 * m_p * n_p,
        transcendentals=m_p * n_p,
        bytes_accessed=int(x2d.size * x2d.dtype.itemsize
                           + wv.size * wv.dtype.itemsize
                           + b.size * b.dtype.itemsize
                           + m_p * n_p * jnp.dtype(out_dtype).itemsize),
    )

    out = pl.pallas_call(
        _swiglu_kernel,
        out_shape=jax.ShapeDtypeStruct((m_p, n_p), out_dtype),
        grid_spec=pltpu.PrefetchScalarGridSpec(
            num_scalar_prefetch=0,
            grid=grid,
            in_specs=[
                # x token tile: streamed along the inner grid axis.
                pl.BlockSpec((tm_eff, dim), lambda j, i: (i, 0)),
                # fused [W_j | V_j] tile: index depends only on the outer j,
                # so the tile stays resident (no re-DMA) across the token sweep.
                pl.BlockSpec((dim, 2 * tn_eff), lambda j, i: (0, j)),
                # fused bias tile (f32).
                pl.BlockSpec((1, 2 * tn_eff), lambda j, i: (0, j)),
            ],
            out_specs=pl.BlockSpec((tm_eff, tn_eff), lambda j, i: (i, j)),
        ),
        compiler_params=pltpu.CompilerParams(
            dimension_semantics=("parallel", "parallel"),
            vmem_limit_bytes=48 * 1024 * 1024,
        ),
        cost_estimate=cost,
    )(x2d, wv, b)

    return out[:M, :dim].reshape(orig_shape)


def swiglu_ref(x, w, b_w, v, b_v):
    wx = x @ w + b_w
    vx = x @ v + b_v
    return jax.nn.silu(wx) * vx


if __name__ == "__main__":
    key = jax.random.PRNGKey(0)
    batch, seq, dim = 2, 8, 32

    k_x, k_w, k_bw, k_v, k_bv = jax.random.split(key, 5)
    bound = 1.0 / (dim ** 0.5)  # matches torch nn.Linear default init range

    x = jax.random.normal(k_x, (batch, seq, dim), dtype=jnp.float32)
    # Weights stored pre-transposed as (in, out); equivalent to PyTorch's x @ W^T.
    w = jax.random.uniform(k_w, (dim, dim), minval=-bound, maxval=bound, dtype=jnp.float32)
    b_w = jax.random.uniform(k_bw, (dim,), minval=-bound, maxval=bound, dtype=jnp.float32)
    v = jax.random.uniform(k_v, (dim, dim), minval=-bound, maxval=bound, dtype=jnp.float32)
    b_v = jax.random.uniform(k_bv, (dim,), minval=-bound, maxval=bound, dtype=jnp.float32)

    ref = swiglu_ref(x, w, b_w, v, b_v)

    # f32 path (strict check).
    out = jax.block_until_ready(swiglu_pallas(x, w, b_w, v, b_v))
    assert out.shape == (batch, seq, dim)
    assert jnp.allclose(out, ref, atol=1e-5, rtol=1e-5), "f32 mismatch vs reference"

    # bf16 MXU path (f32 accumulation) — the recommended mode on v6e/v7x.
    out_bf16 = jax.block_until_ready(
        swiglu_pallas(x, w, b_w, v, b_v, compute_dtype=jnp.bfloat16))
    assert out_bf16.shape == (batch, seq, dim)
    assert jnp.allclose(out_bf16, ref, atol=1e-1, rtol=1e-1), "bf16 mismatch vs reference"

    print("KERNEL_OK")
</pallas_src>

<mosaic_0001>
module attributes {stable_mosaic.version = 11 : i64} {
  func.func @_swiglu_kernel(%arg0: i32, %arg1: i32, %arg2: memref<16x32xf32, #tpu.memory_space<vmem>>, %arg3: memref<32x256xf32, #tpu.memory_space<vmem>>, %arg4: memref<1x256xf32, #tpu.memory_space<vmem>>, %arg5: memref<16x128xf32, #tpu.memory_space<vmem>>) attributes {dimension_semantics = [#tpu.dimension_semantics<parallel>, #tpu.dimension_semantics<parallel>], iteration_bounds = array<i64: 1, 1>, scalar_prefetch = 0 : i64, scratch_operands = 0 : i64, tpu.core_type = #tpu.core_type<tc>, window_params = [{transform_indices = @transform_0, window_bounds = array<i64: 16, 32>}, {transform_indices = @transform_1, window_bounds = array<i64: 32, 256>}, {transform_indices = @transform_2, window_bounds = array<i64: 1, 256>}, {transform_indices = @transform_3, window_bounds = array<i64: 16, 128>}]} {
    %c0 = arith.constant 0 : index
    %c0_0 = arith.constant 0 : index
    %0 = vector.load %arg2[%c0, %c0_0] : memref<16x32xf32, #tpu.memory_space<vmem>>, vector<16x32xf32>
    %c0_1 = arith.constant 0 : index
    %c0_2 = arith.constant 0 : index
    %1 = vector.load %arg3[%c0_1, %c0_2] : memref<32x256xf32, #tpu.memory_space<vmem>>, vector<32x256xf32>
    %cst = arith.constant dense<0.000000e+00> : vector<16x256xf32>
    %2 = tpu.matmul %0, %1, %cst {dimension_numbers = #tpu.dot_dimension_numbers<[1], [0], [0], [1], [0, 0, 1, 1], [], []>} : vector<16x32xf32>, vector<32x256xf32>, vector<16x256xf32> -> vector<16x256xf32>
    %c0_3 = arith.constant 0 : index
    %c0_4 = arith.constant 0 : index
    %3 = vector.load %arg4[%c0_3, %c0_4] : memref<1x256xf32, #tpu.memory_space<vmem>>, vector<1x256xf32>
    %4 = vector.broadcast %3 : vector<1x256xf32> to vector<16x256xf32>
    %5 = arith.addf %2, %4 : vector<16x256xf32>
    %6 = vector.extract_strided_slice %5 {offsets = [0, 0], sizes = [16, 128], strides = [1, 1]} : vector<16x256xf32> to vector<16x128xf32>
    %7 = vector.extract_strided_slice %5 {offsets = [0, 128], sizes = [16, 128], strides = [1, 1]} : vector<16x256xf32> to vector<16x128xf32>
    %8 = arith.negf %6 : vector<16x128xf32>
    %9 = math.exp %8 : vector<16x128xf32>
    %cst_5 = arith.constant 1.000000e+00 : f32
    %10 = vector.broadcast %cst_5 : f32 to vector<16x128xf32>
    %11 = arith.addf %10, %9 : vector<16x128xf32>
    %12 = arith.divf %10, %11 : vector<16x128xf32>
    %13 = arith.mulf %6, %12 : vector<16x128xf32>
    %14 = arith.mulf %13, %7 : vector<16x128xf32>
    %c0_6 = arith.constant 0 : index
    %c0_7 = arith.constant 0 : index
    %15 = vector.load %arg5[%c0_6, %c0_7] : memref<16x128xf32, #tpu.memory_space<vmem>>, vector<16x128xf32>
    tpu.vector_store %arg5[%c0_6, %c0_7], %14 {strides = array<i32>} : memref<16x128xf32, #tpu.memory_space<vmem>>, vector<16x128xf32>,
    return
  }
  func.func @transform_0(%arg0: i32, %arg1: i32) -> (i32, i32) {
    %c0_i32 = arith.constant 0 : i32
    %c0_i32_0 = arith.constant 0 : i32
    return %arg1, %c0_i32 : i32, i32
  }
  func.func @transform_1(%arg0: i32, %arg1: i32) -> (i32, i32) {
    %c0_i32 = arith.constant 0 : i32
    %c0_i32_0 = arith.constant 0 : i32
    return %c0_i32, %arg0 : i32, i32
  }
  func.func @transform_2(%arg0: i32, %arg1: i32) -> (i32, i32) {
    %c0_i32 = arith.constant 0 : i32
    %c0_i32_0 = arith.constant 0 : i32
    return %c0_i32, %arg0 : i32, i32
  }
  func.func @transform_3(%arg0: i32, %arg1: i32) -> (i32, i32) {
    %c0_i32 = arith.constant 0 : i32
    return %arg1, %arg0 : i32, i32
  }
}

</mosaic_0001>

<bundles_post_ra>
// kernel: tpu_custom_call.1
= control target key start
LH: loop header
LB: loop body
LE: loop exit
PB: predicated region body
PF: predicated region fallthrough
CT: control target
= control target key end

     0   :  { %8 = vsyncpa [#allocation3], 0  ;;  %s362_s0 = inlined_call_operand.hbm [shape: f32[16,32], index: 0, kind: input, shape index: {}]   ;;  %s363_s1 = inlined_call_operand.hbm [shape: f32[32,256], index: 1, kind: input, shape index: {}]   ;;  %s364_s2 = inlined_call_operand.vmem [shape: f32[1,256], index: 2, kind: input, shape index: {}]   ;;  %s365_s3 = inlined_call_operand.hbm [shape: f32[16,128], index: 3, kind: output, shape index: {}]  }
   0x1   :  { %9 = vsyncpa [#allocation6], 0 }
   0x2   :  { %10 = vsyncpa [#allocation4], 0  ;;  %s289_s12 = smov [#allocation2]   ;;  %s217_s16 = scalar_lea.hbm %s362_s0, 256 }
   0x3   :  { %s16_s13 = sshll.u32 %s289_s12, 4  ;;  %p218_p0 = scmp.ne.s32.totalorder %s362_s0, %s217_s16  ;;  %s17_s13 = int_to_ptr.vmem [resolvable:$true] %s16_s13 }
   0x4   :  { %p221_p1 = scmp.lt.u32.totalorder %s217_s16, %s362_s0 }
   0x6   :  { %p223_p2 = pnand %p221_p1, %p218_p0 }
   0x8   :  { %226 = shalt.err (!%p223_p2)
}
   0x9   :  { %s227_s21 = scalar_lea.vmem %s17_s13, 256  ;;  %p232_p4 = scmp.lt.s32.totalorder %s17_s13, %s17_s13 }
   0xa   :  { %p228_p3 = scmp.ne.s32.totalorder %s17_s13, %s227_s21  ;;  %p233_p5 = scmp.lt.s32.totalorder %s227_s21, %s227_s21 }
   0xc   :  { %p234_p6 = por %p233_p5, %p232_p4 }
   0xe   :  { %p235_p7 = pnand %p234_p6, %p228_p3 }
  0x10   :  { %238 = shalt.err (!%p235_p7)
}
  0x11   :  { %s290_s22 = smov 128   ;;  %s291_s23 = smov 8  }
  0x12   :  { %22 = dma.hbm_to_vmem [thread:$0]  %s362_s0, 256, %s17_s13, [#allocation3], %s290_s22, %s290_s22, %s291_s23  }
  0x13   :  { %s292_s26 = smov [#allocation5]   ;;  %s239_s30 = scalar_lea.hbm %s363_s1, 1024 }
  0x14   :  { %s28_s27 = sshll.u32 %s292_s26, 4  ;;  %p240_p8 = scmp.ne.s32.totalorder %s363_s1, %s239_s30  ;;  %s29_s27 = int_to_ptr.vmem [resolvable:$true] %s28_s27 }
  0x15   :  { %p243_p9 = scmp.lt.u32.totalorder %s239_s30, %s363_s1 }
  0x17   :  { %p245_p10 = pnand %p243_p9, %p240_p8 }
  0x19   :  { %248 = shalt.err (!%p245_p10)
}
  0x1a   :  { %s249_s8 = scalar_lea.vmem %s29_s27, 1024  ;;  %p254_p12 = scmp.lt.s32.totalorder %s29_s27, %s29_s27 }
  0x1b   :  { %p250_p11 = scmp.ne.s32.totalorder %s29_s27, %s249_s8  ;;  %p255_p13 = scmp.lt.s32.totalorder %s249_s8, %s249_s8 }
  0x1d   :  { %p256_p0 = por %p255_p13, %p254_p12 }
  0x1f   :  { %p257_p1 = pnand %p256_p0, %p250_p11 }
  0x21   :  { %260 = shalt.err (!%p257_p1)
}
  0x22   :  { %s293_s0 = smov 256   ;;  %s294_s9 = smov 16  }
  0x23   :  { %34 = dma.hbm_to_vmem [thread:$0]  %s363_s1, 1024, %s29_s27, [#allocation6], %s293_s0, %s293_s0, %s294_s9  }
  0x24   :  { %283 = dma.done.wait [#allocation3], 256  }
  0x25   :  { %284 = vsyncadd [#allocation3], 4294967040 }
  0x26   :  { %285 = dma.done.wait [#allocation6], 1024  }
  0x27   :  { %286 = vsyncadd [#allocation6], 4294966272  ;;  %v295_v0 = vmov 0.0   ;;  %v46_v1 = vld [vmem:[#allocation5 + $0x8] sm:$0xff]  ;;  %v48_v2 = vld [vmem:[#allocation5 + $0x18] sm:$0xff]  ;;  %vm65_vm0 = vcmask 261120   ;;  %v55_v15 = vlaneseq }
  0x28   :  { %136 = vmatprep.mubr.f32.mxu0 %v295_v0  ;;  %142 = vmatprep.mubr.f32.mxu1 %v295_v0  ;;  %v45_v3 = vld [vmem:[#allocation5] sm:$0xff]  ;;  %v189_v4 = vpack.c.bf16 %v48_v2, %v46_v1  ;;  %v47_v5 = vld [vmem:[#allocation5 + $0x10] sm:$0xff]  ;;  %v50_v6 = vld [vmem:[#allocation5 + $0x28] sm:$0xff] }
  0x29   :  { %v52_v7 = vld [vmem:[#allocation5 + $0x38] sm:$0xff]  ;;  %v191_v8 = vpack.c.bf16 %v47_v5, %v45_v3  ;;  %v49_v10 = vld [vmem:[#allocation5 + $0x20] sm:$0xff]  ;;  %v51_v11 = vld [vmem:[#allocation5 + $0x30] sm:$0xff]  ;;  %v56_v16 = vshrl.u32 %v55_v15, 7 }
  0x2a   :  { %v193_v9 = vpack.c.bf16 %v52_v7, %v50_v6  ;;  %190 = vmatprep.subr.bf16.mxu0 %v189_v4  ;;  %197 = vmatprep.subr.bf16.mxu1 %v189_v4  ;;  %v195_v12 = vpack.c.bf16 %v51_v11, %v49_v10  ;;  %v43_v13 = vld [vmem:[#allocation2] sm:$0xff]  ;;  %v44_v14 = vld [vmem:[#allocation2 + $0x8] sm:$0xff] }
  0x2b   :  { %192 = vmatpush1.bf16.msra.mxu0 %v191_v8  ;;  %199 = vmatpush1.bf16.msra.mxu1 %v191_v8  ;;  %v57_v17 = vsub.s32 0, %v56_v16  ;;  %v53_v18 = vld [vmem:[%s364_s2] sm:$0x3]  ;;  %v61_v32 = vsub.s32 1, %v56_v16  ;;  %s296_s2 = smov [#allocation7]  }
  0x2c   :  { %194 = vmatprep.subr.bf16.mxu0 %v193_v9  ;;  %198 = vmatprep.subr.bf16.mxu1 %v193_v9  ;;  %s172_s13 = sshll.u32 %s296_s2, 4  ;;  %s173_s13 = int_to_ptr.vmem [resolvable:$true] %s172_s13 }
  0x2d   :  { %v58_v19 = vrot.slane %v53_v18, %v57_v17  ;;  %v62_v33 = vrot.slane %v53_v18, %v61_v32  ;;  %s261_s14 = scalar_lea.vmem %s173_s13, 256  ;;  %p266_p3 = scmp.lt.s32.totalorder %s173_s13, %s173_s13 }
  0x2e   :  { %p262_p2 = scmp.ne.s32.totalorder %s173_s13, %s261_s14  ;;  %p267_p4 = scmp.lt.s32.totalorder %s261_s14, %s261_s14 }
  0x2f   :  { %196 = vmatpush1.bf16.msra.mxu0 %v195_v12  ;;  %200 = vmatpush1.bf16.msra.mxu1 %v195_v12 }
  0x30   :  { %p268_p5 = por %p267_p4, %p266_p3 }
  0x32   :  { %185 = vmatmul.mubr.msk.f32.vlgmr.msra.gmra.mrb[0].mxu0 %vm65_vm0, %v43_v13  ;;  %186 = vmatmul.mubr.msk.f32.vlgmr.msra.gmra.mrb[0].mxu1 %vm65_vm0, %v44_v14  ;;  %p269_p6 = pnand %p268_p5, %p262_p2 }
 0x105   :  { %v138_v20 = vpop.f32.mrb[0].mxu0  ;;  %v144_v21 = vpop.f32.mrb[0].mxu1 }
 0x106   :  { %v139_v22 = vadd.f32 %v138_v20, %v58_v19  ;;  %v145_v23 = vadd.f32 %v144_v21, %v58_v19  ;;  %v140_v24 = vpop.f32.mrb[1].mxu0  ;;  %v146_v25 = vpop.f32.mrb[1].mxu1 }
 0x107   :  { %v141_v37 = vadd.f32 %v140_v24, %v62_v33  ;;  %v147_v39 = vadd.f32 %v146_v25, %v62_v33 }
 0x108   :  { %v187_v26 = vmul.f32 -1.442695, %v139_v22  ;;  %v188_v27 = vmul.f32 -1.442695, %v145_v23 }
 0x10a   :  { %209 = vpow2.f32 %v187_v26 }
 0x10b   :  { %211 = vpow2.f32 %v188_v27 }
 0x114   :  { %v210_v28 = vpop.eup %209 }
 0x115   :  { %v212_v29 = vpop.eup %211  ;;  %v155_v30 = vadd.f32 1.0, %v210_v28 }
 0x116   :  { %v156_v31 = vadd.f32 1.0, %v212_v29 }
 0x117   :  { %213 = vrcp.f32 %v155_v30 }
 0x118   :  { %215 = vrcp.f32 %v156_v31 }
 0x121   :  { %v214_v34 = vpop.eup %213 }
 0x122   :  { %v216_v35 = vpop.eup %215  ;;  %v161_v36 = vmul.f32 %v214_v34, %v139_v22 }
 0x123   :  { %v162_v38 = vmul.f32 %v216_v35, %v145_v23 }
 0x124   :  { %v163_v40 = vmul.f32 %v161_v36, %v141_v37 }
 0x125   :  { %v164_v41 = vmul.f32 %v162_v38, %v147_v39 }
 0x126   :  { %165 = vst [vmem:[#allocation7] sm:$0xff] %v163_v40 }
 0x127   :  { %166 = vst [vmem:[#allocation7 + $0x8] sm:$0xff] %v164_v41 }
 0x128   :  { %272 = shalt.err (!%p269_p6)
}
 0x129   :  { %s273_s17 = scalar_lea.hbm %s365_s3, 256 }
 0x12a   :  { %p274_p7 = scmp.ne.s32.totalorder %s365_s3, %s273_s17  ;;  %p277_p8 = scmp.lt.u32.totalorder %s273_s17, %s365_s3 }
 0x12c   :  { %p279_p9 = pnand %p277_p8, %p274_p7 }
 0x12e   :  { %282 = shalt.err (!%p279_p9)
}
 0x12f   :  { %178 = dma.vmem_to_hbm [thread:$0]  %s173_s13, 256, %s365_s3, [#allocation4], %s290_s22, %s290_s22, %s291_s23  }
 0x130   :  { %287 = dma.done.wait [#allocation4], 256  }
 0x131   :  { %288 = vsyncadd [#allocation4], 4294967040 }
 0x132   :  { %182 = vsyncpa [#allocation3], 1 }
 0x133   :  { %183 = vsyncpa [#allocation6], 1 }
 0x134   :  { %184 = vsyncpa [#allocation4], 1 }

</bundles_post_ra>
